<compile_context>
chip_gen: v7x
topology: tpu7x:2x2x1
jax: 0.10.0
libtpu: 0.0.40
codegen_flags: <defaults>
</compile_context>

<pallas_src>
import functools

import jax
import jax.numpy as jnp
from jax import lax
from jax.experimental import pallas as pl
from jax.experimental.pallas import tpu as pltpu

_EPS = 1e-12            # matches F.normalize default eps
_EPS_SQ = _EPS * _EPS   # clamp on sum-of-squares  (norm >= eps  <=>  sumsq >= eps^2)


def _rownorm_kernel(x_ref, o_ref):
    """Each physical row is one logical row: reduce over the full lane axis."""
    x_in = x_ref[...]
    xf = x_in.astype(jnp.float32)                       # no-op for f32 inputs
    sumsq = jnp.sum(xf * xf, axis=-1, keepdims=True)
    inv = lax.rsqrt(jnp.maximum(sumsq, jnp.float32(_EPS_SQ)))   # EUP, free slot
    # Multiply/store in the input dtype (bf16 path stays bf16-wide on the VPU).
    o_ref[...] = (x_in * inv.astype(x_in.dtype)).astype(o_ref.dtype)


def _segmented_rownorm_kernel(x_ref, seg_ref, o_ref, *, precision):
    """Lane-dense path: each physical row packs k logical rows of length d.

    seg_ref is a (lane, lane) block-diagonal 0/1 matrix with d x d blocks, so
    (x*x) @ seg yields each segment's sum of squares, already broadcast back
    across that segment's lanes.
    """
    x_in = x_ref[...]
    xf = x_in.astype(jnp.float32)
    seg_sumsq = jnp.dot(xf * xf, seg_ref[...],
                        preferred_element_type=jnp.float32,
                        precision=precision)
    inv = lax.rsqrt(jnp.maximum(seg_sumsq, jnp.float32(_EPS_SQ)))
    o_ref[...] = (x_in * inv.astype(x_in.dtype)).astype(o_ref.dtype)


def _row_align(dtype):
    # Native sublane packing: 8 rows (4-byte), 16 (2-byte), 32 (1-byte).
    itemsize = jnp.dtype(dtype).itemsize
    return max(8, 32 // itemsize)


def _round_up(v, m):
    return ((v + m - 1) // m) * m


def _pick_row_tile(lane_width, dtype, target_bytes=4 * 1024 * 1024):
    """~4 MiB of f32 working set per block, aligned to the dtype's row packing."""
    align = _row_align(dtype)
    bytes_per_row = lane_width * 4          # f32 working copy dominates VMEM use
    tile = (target_bytes // bytes_per_row) // align * align
    return int(max(align, tile))


def _derive_vmem_limit(rt, lane_width, dtype):
    """VMEM limit from the actual block footprint, capped for v7x's 64 MiB VMEM."""
    itemsize = jnp.dtype(dtype).itemsize
    io_block = rt * lane_width * itemsize
    f32_block = rt * lane_width * 4
    seg_bytes = 2 * 128 * 128 * 4
    # 2x double-buffered input + 2x double-buffered output + ~2 f32-sized temps.
    need = 4 * io_block + 2 * f32_block + seg_bytes
    need = int(need * 1.25) + (2 << 20)                 # scheduler slack
    return int(max(16 << 20, min(need, 48 << 20)))


def normalize_layer(x, *, row_tile=None, vmem_limit_bytes=None):
    """Pallas implementation of F.normalize(x, dim=-1, p=2)."""
    if x.ndim == 0:
        raise ValueError("normalize_layer requires at least 1 dimension")
    orig_shape = x.shape
    d = int(orig_shape[-1])
    rows = 1
    for s in orig_shape[:-1]:
        rows *= int(s)
    if rows == 0 or d == 0:
        return x

    x_flat = x.reshape(rows, d)

    # Lane-dense packing for narrow last dims.  Pad the row count to a multiple
    # of k so awkward row counts no longer fall back to masked stores; padded
    # rows are zeros -> normalize to zeros -> sliced off before returning.
    k = 1
    pad_rows = 0
    if 0 < d < 128 and 128 % d == 0:
        k = 128 // d
        pad_rows = (-rows) % k
        if pad_rows:
            x_flat = jnp.pad(x_flat, ((0, pad_rows), (0, 0)))
    # Note: d < 128 with 128 % d != 0 still uses lane_width == d (a partial pack
    # could not reach 128 lanes either), so those shapes take masked stores.
    lane_width = k * d
    padded_rows = rows + pad_rows
    packed_rows = padded_rows // k
    x2 = x_flat.reshape(packed_rows, lane_width)

    align = _row_align(x.dtype)
    if row_tile is None:
        rt = _pick_row_tile(lane_width, x.dtype)
    else:
        rt = max(align, (int(row_tile) // align) * align)

    if packed_rows <= align:
        rt = packed_rows                     # tiny slab: one full-extent block
        nblocks = 1
    else:
        nblocks = pl.cdiv(packed_rows, rt)
        if nblocks == 1 and packed_rows >= 2 * align:
            nblocks = 2                      # give both v7x TensorCores work
        # Rebalance block sizes (never increases nblocks) so the last block is
        # not a tiny ragged straggler that leaves one core idle.
        rt = min(rt, _round_up(pl.cdiv(packed_rows, nblocks), align))
        nblocks = pl.cdiv(packed_rows, rt)
    grid = (nblocks,)                        # no host-side pad on the row axis;
                                             # the ragged last block is masked and
                                             # the reduction is per-row so garbage
                                             # rows never leak.

    if vmem_limit_bytes is None:
        vmem_limit_bytes = _derive_vmem_limit(rt, lane_width, x.dtype)

    compiler_params = pltpu.CompilerParams(
        dimension_semantics=("parallel",),   # row axis is embarrassingly parallel
        vmem_limit_bytes=int(vmem_limit_bytes),
    )
    out_shape = jax.ShapeDtypeStruct((packed_rows, lane_width), x.dtype)

    if k > 1:
        lane_i = lax.broadcasted_iota(jnp.int32, (lane_width, lane_width), 0) // d
        lane_j = lax.broadcasted_iota(jnp.int32, (lane_width, lane_width), 1) // d
        seg_mat = (lane_i == lane_j).astype(jnp.float32)   # block-diagonal 0/1

        # f32 inputs: 6-pass (exact) seg-matmul; narrower inputs: 3-pass, which
        # keeps v5e's slower MXU safely hidden under the HBM stream.
        precision = (lax.Precision.HIGHEST
                     if jnp.dtype(x.dtype).itemsize >= 4
                     else lax.Precision.HIGH)
        kern = functools.partial(_segmented_rownorm_kernel, precision=precision)

        out = pl.pallas_call(
            kern,
            out_shape=out_shape,
            grid_spec=pltpu.PrefetchScalarGridSpec(
                num_scalar_prefetch=0,
                grid=grid,
                in_specs=[
                    pl.BlockSpec((rt, lane_width), lambda i: (i, 0)),
                    pl.BlockSpec((lane_width, lane_width), lambda i: (0, 0)),
                ],
                out_specs=pl.BlockSpec((rt, lane_width), lambda i: (i, 0)),
            ),
            compiler_params=compiler_params,
        )(x2, seg_mat)
    else:
        out = pl.pallas_call(
            _rownorm_kernel,
            out_shape=out_shape,
            grid_spec=pltpu.PrefetchScalarGridSpec(
                num_scalar_prefetch=0,
                grid=grid,
                in_specs=[pl.BlockSpec((rt, lane_width), lambda i: (i, 0))],
                out_specs=pl.BlockSpec((rt, lane_width), lambda i: (i, 0)),
            ),
            compiler_params=compiler_params,
        )(x2)

    out = out.reshape(padded_rows, d)
    if pad_rows:
        out = out[:rows]
    return out.reshape(orig_shape)


def _reference(x):
    norm = jnp.sqrt(jnp.sum(x.astype(jnp.float32) ** 2, axis=-1, keepdims=True))
    return (x.astype(jnp.float32) / jnp.maximum(norm, _EPS)).astype(x.dtype)


if __name__ == "__main__":
    key = jax.random.PRNGKey(0)
    k0, k1, k2 = jax.random.split(key, 3)

    # Primary case: NCHW-style input; normalization is over the last axis.
    x = jax.random.normal(k0, (2, 4, 16, 16), dtype=jnp.float32)
    y = jax.block_until_ready(normalize_layer(x))
    assert y.shape == x.shape and y.dtype == x.dtype
    assert jnp.allclose(y, _reference(x), atol=1e-6, rtol=1e-6)

    # Packed path with a row count that needs padding (rows=15, d=16 -> k=8).
    x_pad = jax.random.normal(k1, (3, 5, 16), dtype=jnp.float32)
    y_pad = jax.block_until_ready(normalize_layer(x_pad))
    assert jnp.allclose(y_pad, _reference(x_pad), atol=1e-6, rtol=1e-6)

    # Wide last dim (>= 128): unpacked per-row reduction path.
    x_wide = jax.random.normal(k2, (2, 8, 256), dtype=jnp.float32)
    y_wide = jax.block_until_ready(normalize_layer(x_wide))
    assert jnp.allclose(y_wide, _reference(x_wide), atol=1e-6, rtol=1e-6)

    print("KERNEL_OK")
</pallas_src>

<mosaic_0001>
module attributes {stable_mosaic.version = 11 : i64} {
  func.func @_segmented_rownorm_kernel(%arg0: i32, %arg1: memref<8x128xf32, #tpu.memory_space<vmem>>, %arg2: memref<128x128xf32, #tpu.memory_space<vmem>>, %arg3: memref<8x128xf32, #tpu.memory_space<vmem>>) attributes {dimension_semantics = [#tpu.dimension_semantics<parallel>], iteration_bounds = array<i64: 2>, scalar_prefetch = 0 : i64, scratch_operands = 0 : i64, tpu.core_type = #tpu.core_type<tc>, window_params = [{transform_indices = @transform_0, window_bounds = array<i64: 8, 128>}, {pipeline_mode = #tpu.pipeline_mode<synchronous>, transform_indices = @transform_1, window_bounds = array<i64: 128, 128>}, {transform_indices = @transform_2, window_bounds = array<i64: 8, 128>}]} {
    %c0 = arith.constant 0 : index
    %c0_0 = arith.constant 0 : index
    %0 = vector.load %arg1[%c0, %c0_0] : memref<8x128xf32, #tpu.memory_space<vmem>>, vector<8x128xf32>
    %1 = arith.mulf %0, %0 : vector<8x128xf32>
    %c0_1 = arith.constant 0 : index
    %c0_2 = arith.constant 0 : index
    %2 = vector.load %arg2[%c0_1, %c0_2] : memref<128x128xf32, #tpu.memory_space<vmem>>, vector<128x128xf32>
    %cst = arith.constant dense<0.000000e+00> : vector<8x128xf32>
    %3 = tpu.matmul %1, %2, %cst {dimension_numbers = #tpu.dot_dimension_numbers<[1], [0], [0], [1], [0, 0, 1, 1], [], []>, precision = #tpu.contract_precision<fp32>} : vector<8x128xf32>, vector<128x128xf32>, vector<8x128xf32> -> vector<8x128xf32>
    %cst_3 = arith.constant 1.000000e-24 : f32
    %4 = vector.broadcast %cst_3 : f32 to vector<8x128xf32>
    %5 = arith.maximumf %3, %4 : vector<8x128xf32>
    %6 = math.rsqrt %5 : vector<8x128xf32>
    %7 = arith.mulf %0, %6 : vector<8x128xf32>
    %c0_4 = arith.constant 0 : index
    %c0_5 = arith.constant 0 : index
    %8 = vector.load %arg3[%c0_4, %c0_5] : memref<8x128xf32, #tpu.memory_space<vmem>>, vector<8x128xf32>
    tpu.vector_store %arg3[%c0_4, %c0_5], %7 {strides = array<i32>} : memref<8x128xf32, #tpu.memory_space<vmem>>, vector<8x128xf32>,
    return
  }
  func.func @transform_0(%arg0: i32) -> (i32, i32) {
    %c0_i32 = arith.constant 0 : i32
    %c0_i32_0 = arith.constant 0 : i32
    return %arg0, %c0_i32 : i32, i32
  }
  func.func @transform_1(%arg0: i32) -> (i32, i32) {
    %c0_i32 = arith.constant 0 : i32
    %c0_i32_0 = arith.constant 0 : i32
    %c0_i32_1 = arith.constant 0 : i32
    return %c0_i32, %c0_i32_0 : i32, i32
  }
  func.func @transform_2(%arg0: i32) -> (i32, i32) {
    %c0_i32 = arith.constant 0 : i32
    %c0_i32_0 = arith.constant 0 : i32
    return %arg0, %c0_i32 : i32, i32
  }
}

</mosaic_0001>

<bundles_post_ra>
// kernel: tpu_custom_call.1
= control target key start
LH: loop header
LB: loop body
LE: loop exit
PB: predicated region body
PF: predicated region fallthrough
CT: control target
= control target key end

     0   :  { %7 = vsyncpa [#allocation3], 0  ;;  %s2082_s0 = inlined_call_operand.hbm [shape: f32[16,128], index: 0, kind: input, shape index: {}]   ;;  %s2083_s1 = inlined_call_operand.hbm [shape: f32[128,128], index: 1, kind: input, shape index: {}]   ;;  %s2084_s2 = inlined_call_operand.hbm [shape: f32[16,128], index: 2, kind: output, shape index: {}]  }
   0x1   :  { %9 = vsyncpa [#allocation3 + $0x1], 0 }
   0x2   :  { %10 = vsyncpa [#allocation6], 0 }
   0x3   :  { %11 = vsyncpa [#allocation4], 0 }
   0x4   :  { %13 = vsyncpa [#allocation4 + $0x1], 0  ;;  %s1627_s9 = smov 0   ;;  %s1629_s10 = smov 0  }
   0x5   :  { %s1631_s11 = smov 0   ;;  %s1633_s12 = smov 0  }
   0x6 LB: > { %s1648_s13 = sadd.s32 4294967295, %s1602_s12   ;;  %s931_s14 = sadd.s32 4294967294, %s1602_s12   ;;  %s1602_s12 = sphi %s1633_s12, %s2104_s12   ;;  %s1598_s11 = sphi %s1631_s11, %s2103_s11   ;;  %s1594_s10 = sphi %s1629_s10, %s2102_s10   ;;  %s1590_s9 = sphi %s1627_s9, %s2101_s9  }
   0x7   : > { %p39_p0 = scmp.ne.s32.totalorder %s1594_s10, %s1590_s9  ;;  %p2085_p1 = scmp.eq.s32.totalorder %s1648_s13, 0 }
   0x8   : > { %p90_p3 = scmp.eq.s32.totalorder %s931_s14, 1  ;;  %p932_p5 = scmp.ge.s32.totalorder %s1602_s12, 1 }
   0x9   : > { %p1657_p4 = por %p2085_p1, %p39_p0  ;;  %p97_p7 = scmp.lt.s32.totalorder %s1602_s12, 3 }
   0xa   : > { %p1662_p6 = por %p90_p3, %p39_p0  ;;  %s1604_s18 = smov [#allocation5]  }
   0xb   : > { %s2088_s15 = scalar_select %p1657_p4, 1, 0 }
   0xc   : > { %s2089_s16 = scalar_select %p1662_p6, 1, 0 }
   0xd   : > { %p1667_p8 = pnand %p932_p5, %p97_p7  ;;  %s109_s19 = sshll.u32 %s1604_s18, 4  ;;  %s1671_s19 = int_to_ptr.vmem [resolvable:$true] %s109_s19 }
   0xe   : > { %s1683_s21 = sadd.s32 1, %s1602_s12   ;;  %s26_s22 = sadd.s32 1, %s1598_s11 }
   0xf   : > { %s2090_s17 = scalar_select %p1667_p8, 1, 0 }
  0x10   : > { %p1418_p9 = pneg %p1667_p8  ;;  %s23_s23 = ssub.s32 %s1602_s12, %s1683_s21 }
  0x11   : > { %s1474_s26 = scalar_lea.hbm %s2083_s1, 2048 }
  0x12   : > { %p1678_p11 = pnand %p1418_p9, %p2085_p1  ;;  %p1475_p12 = scmp.ne.s32.totalorder %s2083_s1, %s1474_s26 }
  0x13   : > { %p1481_p5 = scmp.lt.u32.totalorder %s1474_s26, %s2083_s1 }
  0x14   : > { %p1476_p13 = pneg %p1678_p11 }
  0x16   : > { %p1477_p0 = pnand %p1476_p13, %p1475_p12 }
  0x18   : > { %p1478_p3 = pneg %p1477_p0 }
  0x1a   : > { %p1483_p7 = pnand %p1481_p5, %p1478_p3 }
  0x1c   : > { %1486 = shalt.err (!%p1483_p7)
}
  0x1d   : > { %s1487_s3 = scalar_lea.vmem %s1671_s19, 2048  ;;  %p1495_p2 = scmp.lt.s32.totalorder %s1671_s19, %s1671_s19 }
  0x1e   : > { %p1488_p9 = scmp.ne.s32.totalorder %s1671_s19, %s1487_s3  ;;  %p1496_p6 = scmp.lt.s32.totalorder %s1487_s3, %s1487_s3 }
  0x20   : > { %p1490_p10 = pnand %p1488_p9, %p1476_p13  ;;  %p1497_p4 = por %p1496_p6, %p1495_p2 }
  0x22   : > { %p1491_p1 = pneg %p1490_p10 }
  0x24   : > { %p1498_p8 = pnand %p1497_p4, %p1491_p1 }
  0x26   : > { %1501 = shalt.err (!%p1498_p8)
}
  0x27   : > { %s1605_s4 = smov 128   ;;  %s1606_s5 = smov 8  }
  0x28   : > { %1421 = dma.hbm_to_vmem [thread:$0]  (!%p1678_p11), %s2083_s1, 2048, %s1671_s19, [#allocation6], %s1605_s4, %s1605_s4, %s1606_s5  }
  0x29   : > { %p24_p2 = scmp.eq.s32.totalorder %s23_s23, 0  ;;  %p33_p1 = scmp.ne.s32.totalorder %s1598_s11, %s1594_s10 }
  0x2a   : > { %p34_p4 = scmp.eq.s32.totalorder %s1602_s12, 0  ;;  %p1431_p6 = scmp.lt.s32.totalorder %s1602_s12, 2 }
  0x2b   : > { %s1714_s8 = scalar_select %p24_p2, %s1598_s11, %s26_s22  }
  0x2c   : > { %p35_p8 = por %p34_p4, %p33_p1  ;;  %p2092_p10 = scmp.eq.s32.totalorder %s1648_s13, 1 }
  0x2d   : > { %s123_s18 = sand.u32 1, %s1598_s11   ;;  %s936_s24 = sshll.u32 %s1602_s12, 7 }
  0x2e   : > { %p1718_p12 = por %p2092_p10, %p33_p1  ;;  %s935_s25 = sshll.u32 %s123_s18, 3 }
  0x2f   : > { %s1727_s27 = scalar_lea.hbm %s2082_s0, %s936_s24  ;;  %s127_s19 = scalar_lea.vmem [#allocation2], %s935_s25 }
  0x30   : > { %s134_s22 = sshll.u32 %s127_s19, 4  ;;  %p1729_p11 = pnand %p1431_p6, %p35_p8  ;;  %s1733_s22 = int_to_ptr.vmem [resolvable:$true] %s134_s22 }
  0x31   : > { %s124_s28 = scalar_lea.sflag [#allocation3], %s123_s18  ;;  %s1502_s29 = scalar_lea.hbm %s1727_s27, 128 }
  0x32   : > { %p1503_p13 = scmp.ne.s32.totalorder %s1727_s27, %s1502_s29  ;;  %p1504_p0 = pneg %p1729_p11 }
  0x33   : > { %s1507_s4 = scalar_lea.hbm %s2082_s0, 256  ;;  %p1508_p7 = scmp.lt.u32.totalorder %s1727_s27, %s2082_s0 }
  0x34   : > { %p1505_p3 = pnand %p1504_p0, %p1503_p13  ;;  %p1509_p9 = scmp.lt.u32.totalorder %s1507_s4, %s1502_s29 }
  0x35   : > { %p1511_p1 = scmp.lt.u32.totalorder %s1502_s29, %s1727_s27 }
  0x36   : > { %p1506_p5 = pneg %p1505_p3  ;;  %p1510_p2 = por %p1509_p9, %p1508_p7 }
  0x38   : > { %p1512_p4 = por %p1511_p1, %p1510_p2 }
  0x3a   : > { %p1513_p6 = pnand %p1512_p4, %p1506_p5 }
  0x3c   : > { %1516 = shalt.err (!%p1513_p6)
}
  0x3d   : > { %s1517_s7 = scalar_lea.vmem %s1733_s22, 128  ;;  %s1607_s18 = smov [#allocation2]  }
  0x3e   : > { %p1518_p8 = scmp.ne.s32.totalorder %s1733_s22, %s1517_s7  ;;  %s1522_s24 = sshll.u32 %s1607_s18, 4  ;;  %s1523_s24 = int_to_ptr.vmem [resolvable:$false] %s1522_s24 }
  0x3f   : > { %s1524_s25 = scalar_lea.vmem %s1523_s24, 256  ;;  %p1525_p3 = scmp.lt.s32.totalorder %s1733_s22, %s1523_s24 }
  0x40   : > { %p1520_p10 = pnand %p1518_p8, %p1504_p0  ;;  %p1526_p7 = scmp.lt.s32.totalorder %s1524_s25, %s1517_s7 }
  0x42   : > { %p1521_p13 = pneg %p1520_p10  ;;  %p1527_p9 = por %p1526_p7, %p1525_p3 }
  0x44   : > { %p1528_p2 = pnand %p1527_p9, %p1521_p13 }
  0x46   : > { %1531 = shalt.err (!%p1528_p2)
}
  0x47   : > { %1425 = dma.hbm_to_vmem [thread:$0]  (!%p1729_p11), %s1727_s27, 128, %s1733_s22, %s124_s28  }
  0x48   : > { %p2095_p5 = scmp.ne.s32.totalorder %s2090_s17, 0 }
  0x49   : > { %s1763_s20 = sand.u32 (!%p2095_p5), 1, %s1594_s10   ;;  %p2096_p0 = scmp.ne.s32.totalorder (!%p2095_p5), %s2088_s15, 0 }
  0x4a   : > { %143 = sbr.rel (%p2095_p5) target bundleno = 428 (0x1ac), region = 28  ;;  %s938_s26 = sshll.u32 (!%p2095_p5), %s1763_s20, 3 }
  0x4b   : > { %s146_s19 = scalar_lea.sflag (!%p2095_p5), [#allocation3], %s1763_s20  ;;  %s1769_s29 = scalar_lea.vmem (!%p2095_p5), [#allocation2], %s938_s26 }
  0x51   : > { %1577 = dma.done.wait (%p2096_p0), %s146_s19, 128  }
  0x52   : > { %1579 = vsyncadd (%p2096_p0), %s146_s19, 4294967168  ;;  %p2097_p11 = scmp.eq.s32.totalorder %s1648_s13, 0 }
  0x54   : > { %1581 = dma.done.wait (%p2097_p11), [#allocation6], 2048   ;;  %p2098_p1 = pmov %p2097_p11 }
  0x55   : > { %v1608_v0 = vmov 0.0|0.0   ;;  %vm1609_vm0 = vmmov 0   ;;  %v1610_v1 = vmov 0.0   ;;  %v176_v2 = vld [vmem:[#allocation5] sm:$0xff]  ;;  %v177_v3 = vld [vmem:[#allocation5 + $0x8] sm:$0xff]  ;;  %v178_v4 = vld [vmem:[#allocation5 + $0x10] sm:$0xff] }
  0x56   : > { %1583 = vsyncadd (%p2098_p1), [#allocation6], 4294965248  ;;  %1257 = vmatprep.subr.bf16.mxu1 %v1608_v0  ;;  %1329 = vmatprep.subr.bf16.mxu0 %v1608_v0  ;;  %v193_v5 = vand.u32 4294901760, %v176_v2  ;;  %v196_v6 = vand.u32 4294901760, %v177_v3  ;;  %v179_v7 = vld [vmem:[#allocation5 + $0x18] sm:$0xff]  ;;  %v199_v8 = vand.u32 4294901760, %v178_v4 }
  0x57   : > { %1079 = vmatprep.mubr.msk.f32.mxu1 %vm1609_vm0, %v1610_v1  ;;  %1184 = vmatprep.mubr.msk.f32.mxu0 %vm1609_vm0, %v1610_v1  ;;  %v202_v9 = vand.u32 4294901760, %v179_v7  ;;  %v180_v10 = vld [vmem:[#allocation5 + $0x20] sm:$0xff]  ;;  %v181_v11 = vld [vmem:[#allocation5 + $0x28] sm:$0xff]  ;;  %v182_v16 = vld [vmem:[#allocation5 + $0x30] sm:$0xff]  ;;  %s942_s15 = sshll.u32 %s1648_s13, 7  ;;  %s173_s17 = scalar_lea.vmem [#allocation7], %s938_s26 }
  0x58   : > { %v1785_v12 = vpack.c.bf16 %v196_v6, %v193_v5  ;;  %v205_v14 = vand.u32 4294901760, %v180_v10  ;;  %v208_v15 = vand.u32 4294901760, %v181_v11  ;;  %v183_v17 = vld [vmem:[#allocation5 + $0x38] sm:$0xff]  ;;  %v211_v19 = vand.u32 4294901760, %v182_v16  ;;  %v1802_v22 = vld [vmem:[#allocation5 + $0x40] sm:$0xff]  ;;  %v1804_v23 = vld [vmem:[#allocation5 + $0x48] sm:$0xff]  ;;  %s2038_s28 = scalar_lea.hbm %s2084_s2, %s942_s15 }
  0x59   : > { %v1789_v13 = vpack.c.bf16 %v202_v9, %v199_v8  ;;  %v214_v20 = vand.u32 4294901760, %v183_v17  ;;  %v1798_v21 = vld [vmem:[%s1769_s29] sm:$0xff]  ;;  %v217_v26 = vand.u32 4294901760, %v1802_v22  ;;  %v220_v27 = vand.u32 4294901760, %v1804_v23  ;;  %v1832_v36 = vld [vmem:[#allocation5 + $0x60] sm:$0xff]  ;;  %v1836_v37 = vld [vmem:[#allocation5 + $0x68] sm:$0xff] }
  0x5a   : > { %1259 = vmatpush3.bf16.msra.mxu1 %v1785_v12  ;;  %1331 = vmatpush3.bf16.msra.mxu0 %v1785_v12  ;;  %v1795_v18 = vpack.c.bf16 %v208_v15, %v205_v14  ;;  %v175_v24 = vmul.f32 %v1798_v21, %v1798_v21  ;;  %v1816_v28 = vld [vmem:[#allocation5 + $0x50] sm:$0xff]  ;;  %v1818_v29 = vld [vmem:[#allocation5 + $0x58] sm:$0xff]  ;;  %v1820_v30 = vsub.f32 %v176_v2, %v193_v5  ;;  %v229_v40 = vand.u32 4294901760, %v1832_v36  ;;  %s851_s27 = sshll.u32 %s173_s17, 4  ;;  %s838_s30 = scalar_lea.sflag [#allocation4], %s1763_s20  ;;  %s2040_s27 = int_to_ptr.vmem [resolvable:$true] %s851_s27 }
  0x5b   : > { %1260 = vmatprep.subr.bf16.mxu1 %v1608_v0  ;;  %1332 = vmatprep.subr.bf16.mxu0 %v1608_v0  ;;  %v1810_v25 = vpack.c.bf16 %v214_v20, %v211_v19  ;;  %v1824_v32 = vsub.f32 %v177_v3, %v196_v6  ;;  %v1828_v33 = vpack.c.bf16 %v220_v27, %v217_v26  ;;  %v223_v34 = vand.u32 4294901760, %v1816_v28  ;;  %v1855_v44 = vld [vmem:[#allocation5 + $0x70] sm:$0xff]  ;;  %v1857_v45 = vld [vmem:[#allocation5 + $0x78] sm:$0xff]  ;;  %s1532_s3 = scalar_lea.vmem %s2040_s27, 128  ;;  %s1611_s13 = smov [#allocation7]  }
  0x5c   : > { %v1822_v31 = vand.u32 4294901760, %v175_v24  ;;  %v226_v35 = vand.u32 4294901760, %v1818_v29  ;;  %v1838_v38 = vsub.f32 %v178_v4, %v199_v8  ;;  %v1840_v39 = vsub.f32 %v179_v7, %v202_v9  ;;  %p1533_p4 = scmp.ne.s32.totalorder %s2040_s27, %s1532_s3  ;;  %s1536_s4 = sshll.u32 %s1611_s13, 4  ;;  %s1537_s4 = int_to_ptr.vmem [resolvable:$false] %s1536_s4 }
  0x5d   : > { %v232_v43 = vand.u32 4294901760, %v1836_v37  ;;  %v286_v46 = vand.u32 4294901760, %v1820_v30  ;;  %v293_v47 = vand.u32 4294901760, %v1824_v32  ;;  %v1863_v48 = vsub.f32 %v180_v10, %v205_v14  ;;  %s1538_s5 = scalar_lea.vmem %s1537_s4, 256  ;;  %p1539_p10 = scmp.lt.s32.totalorder %s2040_s27, %s1537_s4 }
  0x5e   : > { %1262 = vmatpush3.bf16.msra.mxu1 %v1789_v13  ;;  %1334 = vmatpush3.bf16.msra.mxu0 %v1789_v13  ;;  %v1844_v41 = vsub.f32 %v175_v24, %v1822_v31  ;;  %v1852_v42 = vpack.c.bf16 %v226_v35, %v223_v34  ;;  %v1865_v49 = vsub.f32 %v181_v11, %v208_v15  ;;  %v235_v50 = vand.u32 4294901760, %v1855_v44  ;;  %p1534_p6 = pnand %p1533_p4, %p1718_p12  ;;  %p1540_p13 = scmp.lt.s32.totalorder %s1538_s5, %s1532_s3 }
  0x5f   : > { %1263 = vmatprep.subr.bf16.mxu1 %v1608_v0  ;;  %1335 = vmatprep.subr.bf16.mxu0 %v1608_v0  ;;  %v238_v51 = vand.u32 4294901760, %v1857_v45  ;;  %v300_v53 = vand.u32 4294901760, %v1838_v38  ;;  %v1877_v54 = vpack.c.bf16 %v232_v43, %v229_v40  ;;  %v287_v55 = vsub.f32 %v1820_v30, %v286_v46 }
  0x60   : > { %v275_v52 = vand.u32 4294901760, %v1844_v41  ;;  %v294_v56 = vsub.f32 %v1824_v32, %v293_v47  ;;  %v307_v57 = vand.u32 4294901760, %v1840_v39  ;;  %v1884_v58 = vsub.f32 %v182_v16, %v211_v19  ;;  %p1535_p8 = pneg %p1534_p6  ;;  %p1541_p3 = por %p1540_p13, %p1539_p10 }
  0x61   : > { %v1886_v59 = vsub.f32 %v183_v17, %v214_v20  ;;  %v301_v61 = vsub.f32 %v1838_v38, %v300_v53  ;;  %v314_v62 = vand.u32 4294901760, %v1863_v48  ;;  %v321_v63 = vand.u32 4294901760, %v1865_v49 }
  0x62   : > { %1265 = vmatpush3.bf16.msra.mxu1 %v1795_v18  ;;  %1337 = vmatpush3.bf16.msra.mxu0 %v1795_v18  ;;  %v276_v60 = vsub.f32 %v1844_v41, %v275_v52  ;;  %v1898_v2 = vpack.c.bf16 %v238_v51, %v235_v50  ;;  %v288_v3 = vand.u32 4294901760, %v287_v55  ;;  %v295_v4 = vand.u32 4294901760, %v294_v56  ;;  %p1542_p7 = pnand %p1541_p3, %p1535_p8 }
  0x63   : > { %1266 = vmatprep.subr.bf16.mxu1 %v1608_v0  ;;  %1338 = vmatprep.subr.bf16.mxu0 %v1608_v0  ;;  %v308_v5 = vsub.f32 %v1840_v39, %v307_v57  ;;  %v1904_v6 = vsub.f32 %v1802_v22, %v217_v26  ;;  %v1907_v7 = vsub.f32 %v1804_v23, %v220_v27  ;;  %v302_v10 = vand.u32 4294901760, %v301_v61 }
  0x64   : > { %v1354_v8 = vpack.c.bf16 %v293_v47, %v286_v46  ;;  %v277_v9 = vand.u32 4294901760, %v276_v60  ;;  %v315_v11 = vsub.f32 %v1863_v48, %v314_v62  ;;  %v322_v14 = vsub.f32 %v1865_v49, %v321_v63 }
  0x65   : > { %v1282_v15 = vpack.c.bf16 %v295_v4, %v288_v3  ;;  %v309_v16 = vand.u32 4294901760, %v308_v5  ;;  %v328_v17 = vand.u32 4294901760, %v1884_v58  ;;  %v335_v19 = vand.u32 4294901760, %v1886_v59 }
  0x66   : > { %1268 = vmatpush3.bf16.msra.mxu1 %v1810_v25  ;;  %1340 = vmatpush3.bf16.msra.mxu0 %v1810_v25  ;;  %v1920_v20 = vsub.f32 %v1816_v28, %v223_v34  ;;  %v1925_v22 = vsub.f32 %v1818_v29, %v226_v35  ;;  %v1357_v23 = vpack.c.bf16 %v307_v57, %v300_v53  ;;  %v316_v24 = vand.u32 4294901760, %v315_v11 }
  0x67   : > { %1269 = vmatprep.subr.bf16.mxu1 %v1608_v0  ;;  %1341 = vmatprep.subr.bf16.mxu0 %v1608_v0  ;;  %v323_v26 = vand.u32 4294901760, %v322_v14  ;;  %v342_v27 = vand.u32 4294901760, %v1904_v6  ;;  %v1285_v46 = vpack.c.bf16 %v309_v16, %v302_v10  ;;  %v329_v47 = vsub.f32 %v1884_v58, %v328_v17 }
  0x68   : > { %v336_v28 = vsub.f32 %v1886_v59, %v335_v19  ;;  %v349_v34 = vand.u32 4294901760, %v1907_v7  ;;  %v1936_v29 = vsub.f32 %v1832_v36, %v229_v40  ;;  %v1941_v35 = vsub.f32 %v1836_v37, %v232_v43 }
  0x69   : > { %v1360_v53 = vpack.c.bf16 %v321_v63, %v314_v62  ;;  %v343_v55 = vsub.f32 %v1904_v6, %v342_v27  ;;  %v356_v56 = vand.u32 4294901760, %v1920_v20  ;;  %v330_v36 = vand.u32 4294901760, %v329_v47 }
  0x6a   : > { %1271 = vmatpush3.bf16.msra.mxu1 %v1828_v33  ;;  %1343 = vmatpush3.bf16.msra.mxu0 %v1828_v33  ;;  %v337_v40 = vand.u32 4294901760, %v336_v28  ;;  %v350_v57 = vsub.f32 %v1907_v7, %v349_v34  ;;  %v363_v37 = vand.u32 4294901760, %v1925_v22  ;;  %v1956_v43 = vsub.f32 %v1855_v44, %v235_v50 }
  0x6b   : > { %1272 = vmatprep.subr.bf16.mxu1 %v1608_v0  ;;  %1344 = vmatprep.subr.bf16.mxu0 %v1608_v0  ;;  %v1961_v60 = vsub.f32 %v1857_v45, %v238_v51  ;;  %v1363_v61 = vpack.c.bf16 %v335_v19, %v328_v17  ;;  %v344_v62 = vand.u32 4294901760, %v343_v55  ;;  %v357_v63 = vsub.f32 %v1920_v20, %v356_v56 }
  0x6c   : > { %v370_v3 = vand.u32 4294901760, %v1936_v29  ;;  %v1291_v4 = vpack.c.bf16 %v337_v40, %v330_v36  ;;  %v351_v5 = vand.u32 4294901760, %v350_v57  ;;  %v377_v44 = vand.u32 4294901760, %v1941_v35 }
  0x6d   : > { %v1366_v45 = vpack.c.bf16 %v349_v34, %v342_v27  ;;  %v358_v50 = vand.u32 4294901760, %v357_v63  ;;  %v1369_v16 = vpack.c.bf16 %v363_v37, %v356_v56  ;;  %v1309_v55 = vpack.c.bf16 %v1840_v39, %v1838_v38 }
  0x6e   : > { %1274 = vmatpush3.bf16.msra.mxu1 %v1852_v42  ;;  %1346 = vmatpush3.bf16.msra.mxu0 %v1852_v42  ;;  %v371_v51 = vsub.f32 %v1936_v29, %v370_v3  ;;  %v1294_v10 = vpack.c.bf16 %v351_v5, %v344_v62  ;;  %v378_v14 = vsub.f32 %v1941_v35, %v377_v44 }
  0x6f   : > { %1275 = vmatprep.subr.bf16.mxu1 %v1608_v0  ;;  %1347 = vmatprep.subr.bf16.mxu0 %v1608_v0 }
  0x70   : > { %v372_v17 = vand.u32 4294901760, %v371_v51 }
  0x72   : > { %1277 = vmatpush3.bf16.msra.mxu1 %v1877_v54  ;;  %1349 = vmatpush3.bf16.msra.mxu0 %v1877_v54 }
  0x73   : > { %1278 = vmatprep.subr.bf16.mxu1 %v1608_v0  ;;  %1350 = vmatprep.subr.bf16.mxu0 %v1608_v0 }
  0x76   : > { %1280 = vmatpush3.bf16.msra.mxu1 %v1898_v2  ;;  %1352 = vmatpush3.bf16.msra.mxu0 %v1898_v2 }
  0x77   : > { %1281 = vmatprep.subr.bf16.mxu1 %v1608_v0  ;;  %1353 = vmatprep.subr.bf16.mxu0 %v1608_v0 }
  0x79   : > { %1080 = vmatmul.mubr.f32.vlgmr.msra.gmra.mrb[0].mxu1 %v277_v9  ;;  %1185 = vmatmul.mubr.f32.vlgmr.msra.gmra.mrb[0].mxu0 %v275_v52  ;;  %v1288_v52 = vpack.c.bf16 %v323_v26, %v316_v24  ;;  %v384_v9 = vand.u32 4294901760, %v1956_v43 }
  0x7a   : > { %1283 = vmatpush3.bf16.msra.mxu1 %v1282_v15  ;;  %1355 = vmatpush3.bf16.msra.mxu0 %v1354_v8  ;;  %v364_v8 = vsub.f32 %v1925_v22, %v363_v37  ;;  %v391_v15 = vand.u32 4294901760, %v1961_v60 }
  0x7b   : > { %1284 = vmatprep.subr.bf16.mxu1 %v1608_v0  ;;  %1356 = vmatprep.subr.bf16.mxu0 %v1608_v0  ;;  %v385_v24 = vsub.f32 %v1956_v43, %v384_v9 }
  0x7c   : > { %1114 = vmatprep.mubr.msk.f32.mxu1 %vm1609_vm0, %v1610_v1  ;;  %1219 = vmatprep.mubr.msk.f32.mxu0 %vm1609_vm0, %v1610_v1  ;;  %v365_v11 = vand.u32 4294901760, %v364_v8  ;;  %v392_v26 = vsub.f32 %v1961_v60, %v391_v15 }
  0x7d   : > { %v386_v47 = vand.u32 4294901760, %v385_v24 }
  0x7e   : > { %1286 = vmatpush3.bf16.msra.mxu1 %v1285_v46  ;;  %1358 = vmatpush3.bf16.msra.mxu0 %v1357_v23  ;;  %v1297_v19 = vpack.c.bf16 %v365_v11, %v358_v50  ;;  %v379_v23 = vand.u32 4294901760, %v378_v14  ;;  %v1372_v46 = vpack.c.bf16 %v377_v44, %v370_v3  ;;  %v393_v28 = vand.u32 4294901760, %v392_v26 }
  0x7f   : > { %1287 = vmatprep.subr.bf16.mxu1 %v1608_v0  ;;  %1359 = vmatprep.subr.bf16.mxu0 %v1608_v0 }
  0x80   : > { %v1300_v27 = vpack.c.bf16 %v379_v23, %v372_v17  ;;  %v1303_v34 = vpack.c.bf16 %v393_v28, %v386_v47 }
  0x82   : > { %1289 = vmatpush3.bf16.msra.mxu1 %v1288_v52  ;;  %1361 = vmatpush3.bf16.msra.mxu0 %v1360_v53  ;;  %v1375_v52 = vpack.c.bf16 %v391_v15, %v384_v9  ;;  %v1306_v53 = vpack.c.bf16 %v1824_v32, %v1820_v30  ;;  %v1312_v30 = vpack.c.bf16 %v1865_v49, %v1863_v48 }
  0x83   : > { %1290 = vmatprep.subr.bf16.mxu1 %v1608_v0  ;;  %1362 = vmatprep.subr.bf16.mxu0 %v1608_v0 }
  0x86   : > { %1292 = vmatpush3.bf16.msra.mxu1 %v1291_v4  ;;  %1364 = vmatpush3.bf16.msra.mxu0 %v1363_v61 }
  0x87   : > { %1293 = vmatprep.subr.bf16.mxu1 %v1608_v0  ;;  %1365 = vmatprep.subr.bf16.mxu0 %v1608_v0 }
  0x8a   : > { %1295 = vmatpush3.bf16.msra.mxu1 %v1294_v10  ;;  %1367 = vmatpush3.bf16.msra.mxu0 %v1366_v45 }
  0x8b   : > { %1296 = vmatprep.subr.bf16.mxu1 %v1608_v0  ;;  %1368 = vmatprep.subr.bf16.mxu0 %v1608_v0 }
  0x8e   : > { %1298 = vmatpush3.bf16.msra.mxu1 %v1297_v19  ;;  %1370 = vmatpush3.bf16.msra.mxu0 %v1369_v16 }
  0x8f   : > { %1299 = vmatprep.subr.bf16.mxu1 %v1608_v0  ;;  %1371 = vmatprep.subr.bf16.mxu0 %v1608_v0 }
  0x92   : > { %1301 = vmatpush3.bf16.msra.mxu1 %v1300_v27  ;;  %1373 = vmatpush3.bf16.msra.mxu0 %v1372_v46 }
  0x93   : > { %1302 = vmatprep.subr.bf16.mxu1 %v1608_v0  ;;  %1374 = vmatprep.subr.bf16.mxu0 %v1608_v0 }
  0x96   : > { %1304 = vmatpush3.bf16.msra.mxu1 %v1303_v34  ;;  %1376 = vmatpush3.bf16.msra.mxu0 %v1375_v52 }
  0x97   : > { %1305 = vmatprep.subr.bf16.mxu1 %v1608_v0  ;;  %1377 = vmatprep.subr.bf16.mxu0 %v1608_v0 }
  0x99   : > { %1115 = vmatmul.mubr.f32.vlgmr.msra.gmra.mrb[0].mxu1 %v1822_v31  ;;  %1220 = vmatmul.mubr.f32.vlgmr.msra.gmra.mrb[0].mxu0 %v1822_v31 }
  0x9a   : > { %1307 = vmatpush3.bf16.msra.mxu1 %v1306_v53  ;;  %1379 = vmatpush3.bf16.msra.mxu0 %v1785_v12  ;;  %v1315_v12 = vpack.c.bf16 %v1886_v59, %v1884_v58 }
  0x9b   : > { %1308 = vmatprep.subr.bf16.mxu1 %v1608_v0  ;;  %1380 = vmatprep.subr.bf16.mxu0 %v1608_v0 }
  0x9c   : > { %1149 = vmatprep.mubr.msk.f32.mxu1 %vm1609_vm0, %v1610_v1  ;;  %1254 = vmatprep.mubr.msk.f32.mxu0 %vm1609_vm0, %v1610_v1  ;;  %v1318_v1 = vpack.c.bf16 %v1907_v7, %v1904_v6 }
  0x9e   : > { %1310 = vmatpush3.bf16.msra.mxu1 %v1309_v55  ;;  %1382 = vmatpush3.bf16.msra.mxu0 %v1789_v13  ;;  %v1321_v13 = vpack.c.bf16 %v1925_v22, %v1920_v20 }
  0x9f   : > { %1311 = vmatprep.subr.bf16.mxu1 %v1608_v0  ;;  %1383 = vmatprep.subr.bf16.mxu0 %v1608_v0 }
  0xa2   : > { %1313 = vmatpush3.bf16.msra.mxu1 %v1312_v30  ;;  %1385 = vmatpush3.bf16.msra.mxu0 %v1795_v18  ;;  %v1324_v18 = vpack.c.bf16 %v1941_v35, %v1936_v29 }
  0xa3   : > { %1314 = vmatprep.subr.bf16.mxu1 %v1608_v0  ;;  %1386 = vmatprep.subr.bf16.mxu0 %v1608_v0 }
  0xa6   : > { %1316 = vmatpush3.bf16.msra.mxu1 %v1315_v12  ;;  %1388 = vmatpush3.bf16.msra.mxu0 %v1810_v25  ;;  %v1327_v25 = vpack.c.bf16 %v1961_v60, %v1956_v43 }
  0xa7   : > { %1317 = vmatprep.subr.bf16.mxu1 %v1608_v0  ;;  %1389 = vmatprep.subr.bf16.mxu0 %v1608_v0 }
  0xaa   : > { %1319 = vmatpush3.bf16.msra.mxu1 %v1318_v1  ;;  %1391 = vmatpush3.bf16.msra.mxu0 %v1828_v33 }
  0xab   : > { %1320 = vmatprep.subr.bf16.mxu1 %v1608_v0  ;;  %1392 = vmatprep.subr.bf16.mxu0 %v1608_v0 }
  0xae   : > { %1322 = vmatpush3.bf16.msra.mxu1 %v1321_v13  ;;  %1394 = vmatpush3.bf16.msra.mxu0 %v1852_v42 }
  0xaf   : > { %1323 = vmatprep.subr.bf16.mxu1 %v1608_v0  ;;  %1395 = vmatprep.subr.bf16.mxu0 %v1608_v0 }
  0xb2   : > { %1325 = vmatpush3.bf16.msra.mxu1 %v1324_v18  ;;  %1397 = vmatpush3.bf16.msra.mxu0 %v1877_v54 }
  0xb3   : > { %1326 = vmatprep.subr.bf16.mxu1 %v1608_v0  ;;  %1398 = vmatprep.subr.bf16.mxu0 %v1608_v0 }
  0xb6   : > { %1328 = vmatpush3.bf16.msra.mxu1 %v1327_v25  ;;  %1400 = vmatpush3.bf16.msra.mxu0 %v1898_v2 }
  0xb9   : > { %1150 = vmatmul.mubr.f32.vlgmr.msra.gmra.mrb[0].mxu1 %v1844_v41  ;;  %1255 = vmatmul.mubr.f32.vlgmr.msra.gmra.mrb[0].mxu0 %v1822_v31 }
 0x18c   : > { %v534_v32 = vpop.f32.mrb[0].mxu1  ;;  %v829_v33 = vpop.f32.mrb[0].mxu0 }
 0x18d   : > { %v1401_v38 = vadd.f32 %v829_v33, %v534_v32  ;;  %v1151_v39 = vpop.f32.mrb[1].mxu1  ;;  %v1256_v42 = vpop.f32.mrb[1].mxu0 }
 0x18f   : > { %v833_v48 = vmax.f32 %v1401_v38, 1e-24 }
 0x191   : > { %1472 = vrsqrt.f32 %v833_v48 }
 0x19b   : > { %v1473_v0 = vpop.eup %1472 }
 0x19c   : > { %v835_v49 = vmul.f32 %v1473_v0, %v1798_v21 }
 0x19e   : > { %836 = vst [vmem:[%s173_s17] sm:$0xff] %v835_v49 }
 0x19f   : > { %1545 = shalt.err (!%p1542_p7)
}
 0x1a0   : > { %s1546_s6 = scalar_lea.hbm %s2038_s28, 128  ;;  %s1550_s24 = scalar_lea.hbm %s2084_s2, 256 }
 0x1a1   : > { %p1547_p9 = scmp.ne.s32.totalorder %s2038_s28, %s1546_s6  ;;  %p1551_p0 = scmp.lt.u32.totalorder %s2038_s28, %s2084_s2 }
 0x1a2   : > { %p1552_p11 = scmp.lt.u32.totalorder %s1550_s24, %s1546_s6  ;;  %p1554_p4 = scmp.lt.u32.totalorder %s1546_s6, %s2038_s28 }
 0x1a3   : > { %p1548_p2 = pnand %p1547_p9, %p1718_p12 }
 0x1a4   : > { %p1553_p1 = por %p1552_p11, %p1551_p0 }
 0x1a5   : > { %p1549_p5 = pneg %p1548_p2 }
 0x1a6   : > { %p1555_p6 = por %p1554_p4, %p1553_p1 }
 0x1a8   : > { %p1556_p8 = pnand %p1555_p6, %p1549_p5 }
 0x1aa   : > { %1559 = shalt.err (!%p1556_p8)
}
 0x1ab   : > { %1416 = dma.vmem_to_hbm [thread:$0]  (%p1718_p12), %s2040_s27, 128, %s2038_s28, %s838_s30  }
 0x1ac PF: > { %s863_s26 = sand.u32 1, %s1590_s9   ;;  %p2099_p10 = scmp.ne.s32.totalorder %s2089_s16, 0 }
 0x1ad   : > { %p2100_p13 = scmp.ge.s32.totalorder %s1602_s12, 2  ;;  %s864_s19 = scalar_lea.sflag [#allocation4], %s863_s26 }
 0x1af   : > { %p1427_p3 = pnand %p2100_p13, %p2099_p10 }
 0x1b1   : > { %1585 = dma.done.wait (!%p1427_p3), %s864_s19, 128  }
 0x1b2   : > { %1587 = vsyncadd (!%p1427_p3), %s864_s19, 4294967168  ;;  %p16_p7 = scmp.ge.s32.totalorder %s1683_s21, 4   ;;  %s2101_s9 = smov %s1594_s10 }
 0x1b3   : > { %s2102_s10 = smov %s1598_s11  ;;  %s2103_s11 = smov %s1714_s8 }
 0x1b4   : > { %s2104_s12 = smov %s1683_s21  ;;  %18 = sbr.rel (!%p16_p7) target bundleno = 6 (0x6), region = 77 }
 0x1bb   :  { %869 = vsyncpa [#allocation3], 1 }
 0x1bc   :  { %871 = vsyncpa [#allocation3 + $0x1], 1 }
 0x1bd   :  { %872 = vsyncpa [#allocation6], 1 }
 0x1be   :  { %873 = vsyncpa [#allocation4], 1 }
 0x1bf   :  { %875 = vsyncpa [#allocation4 + $0x1], 1 }

</bundles_post_ra>
